<compile_context>
chip_gen: v7x
topology: tpu7x:2x2x1
jax: 0.10.0
libtpu: 0.0.40
codegen_flags: <defaults>
</compile_context>

<pallas_src>
import jax
import jax.numpy as jnp
from jax.experimental import pallas as pl
from jax.experimental.pallas import tpu as pltpu


SCALE = 10.0
FACTOR = 0.1

_LANE = 128             # lane-dense last dim (full, unmasked vst)
_MAX_BLOCK_ROWS = 4096  # 4096 x 128 x 4B = 2 MiB per f32 block (~8 MiB working set)


def scaled_tanh_kernel(x_ref, o_ref):
    # Upcast to f32: tanh -> EUP, the two multiplies -> VPU (both off the
    # critical DMA path for this memory-bound kernel).
    x = x_ref[...].astype(jnp.float32)
    o_ref[...] = (SCALE * jnp.tanh(FACTOR * x)).astype(o_ref.dtype)


def _round_up(v, m):
    return ((v + m - 1) // m) * m


def scaled_tanh(x):
    orig_shape = x.shape
    orig_dtype = x.dtype
    n = x.size
    if n == 0:
        return x

    rows = pl.cdiv(n, _LANE)
    # Block rows: multiple of 16 (covers f32's 8 and bf16's 16 sublane packing),
    # capped at _MAX_BLOCK_ROWS so the double-buffered working set stays under
    # the default scoped VMEM limit on every TPU generation.
    block_rows = min(_MAX_BLOCK_ROWS, _round_up(rows, 16))
    padded_rows = _round_up(rows, block_rows)
    n_pad = padded_rows * _LANE

    x_flat = jnp.reshape(x, (-1,))
    if n_pad != n:
        # tanh(0) = 0, so zero padding is harmless; tail is sliced off below.
        x_flat = jnp.pad(x_flat, (0, n_pad - n))
    x2d = jnp.reshape(x_flat, (padded_rows, _LANE))

    grid = (padded_rows // block_rows,)
    out2d = pl.pallas_call(
        scaled_tanh_kernel,
        out_shape=jax.ShapeDtypeStruct((padded_rows, _LANE), orig_dtype),
        grid_spec=pltpu.PrefetchScalarGridSpec(
            num_scalar_prefetch=0,
            grid=grid,
            in_specs=[pl.BlockSpec((block_rows, _LANE), lambda i: (i, 0))],
            out_specs=pl.BlockSpec((block_rows, _LANE), lambda i: (i, 0)),
        ),
        compiler_params=pltpu.CompilerParams(
            # Single parallel axis: Mosaic may shard grid steps across both
            # TensorCores on v7x (no effect on single-TC v5e/v6e).
            dimension_semantics=("parallel",),
        ),
        # Elementwise, same shape/dtype: reuse the input slab as the output.
        input_output_aliases={0: 0},
    )(x2d)

    out_flat = jnp.reshape(out2d, (-1,))
    if n_pad != n:
        out_flat = out_flat[:n]
    return jnp.reshape(out_flat, orig_shape)


if __name__ == "__main__":
    key = jax.random.PRNGKey(0)
    # Small NCHW-shaped input consistent with how this activation is used.
    x = jax.random.normal(key, (2, 4, 16, 16), dtype=jnp.float32) * 5.0

    # jit the wrapper so the reshape/alias plumbing fuses around the kernel and
    # the input_output_aliases target is an internal (donatable) intermediate.
    fn = jax.jit(scaled_tanh)
    out = jax.block_until_ready(fn(x))

    # Reference check against plain JAX.
    ref = SCALE * jnp.tanh(FACTOR * x)
    assert out.shape == x.shape
    assert out.dtype == x.dtype
    assert jnp.max(jnp.abs(out - ref)) < 1e-5

    print("KERNEL_OK")
</pallas_src>

<mosaic_0001>
module attributes {stable_mosaic.version = 11 : i64} {
  func.func @scaled_tanh_kernel(%arg0: i32, %arg1: memref<16x128xf32, #tpu.memory_space<vmem>>, %arg2: memref<16x128xf32, #tpu.memory_space<vmem>>) attributes {dimension_semantics = [#tpu.dimension_semantics<parallel>], iteration_bounds = array<i64: 1>, scalar_prefetch = 0 : i64, scratch_operands = 0 : i64, tpu.core_type = #tpu.core_type<tc>, window_params = [{transform_indices = @transform_0, window_bounds = array<i64: 16, 128>}, {transform_indices = @transform_1, window_bounds = array<i64: 16, 128>}]} {
    %c0 = arith.constant 0 : index
    %c0_0 = arith.constant 0 : index
    %0 = vector.load %arg1[%c0, %c0_0] : memref<16x128xf32, #tpu.memory_space<vmem>>, vector<16x128xf32>
    %cst = arith.constant 1.000000e-01 : f32
    %1 = vector.broadcast %cst : f32 to vector<16x128xf32>
    %2 = arith.mulf %1, %0 : vector<16x128xf32>
    %3 = math.tanh %2 : vector<16x128xf32>
    %cst_1 = arith.constant 1.000000e+01 : f32
    %4 = vector.broadcast %cst_1 : f32 to vector<16x128xf32>
    %5 = arith.mulf %4, %3 : vector<16x128xf32>
    %c0_2 = arith.constant 0 : index
    %c0_3 = arith.constant 0 : index
    %6 = vector.load %arg2[%c0_2, %c0_3] : memref<16x128xf32, #tpu.memory_space<vmem>>, vector<16x128xf32>
    tpu.vector_store %arg2[%c0_2, %c0_3], %5 {strides = array<i32>} : memref<16x128xf32, #tpu.memory_space<vmem>>, vector<16x128xf32>,
    return
  }
  func.func @transform_0(%arg0: i32) -> (i32, i32) {
    %c0_i32 = arith.constant 0 : i32
    %c0_i32_0 = arith.constant 0 : i32
    return %arg0, %c0_i32 : i32, i32
  }
  func.func @transform_1(%arg0: i32) -> (i32, i32) {
    %c0_i32 = arith.constant 0 : i32
    %c0_i32_0 = arith.constant 0 : i32
    return %arg0, %c0_i32 : i32, i32
  }
}

</mosaic_0001>

<bundles_post_ra>
// kernel: scaled_tanh.1
= control target key start
LH: loop header
LB: loop body
LE: loop exit
PB: predicated region body
PF: predicated region fallthrough
CT: control target
= control target key end

     0   :  { %s48_s0 = inlined_call_operand.vmem [shape: f32[16,128], index: 0, kind: input, shape index: {}, may-alias: {0,1}]   ;;  %s49_s1 = inlined_call_operand.vmem [shape: f32[16,128], index: 1, kind: output, shape index: {}, may-alias: {0,1}]  }
   0x1   :  { %v8_v0 = vld [vmem:[%s48_s0] sm:$0xff]  ;;  %v9_v1 = vld [vmem:[%s48_s0 + $0x8] sm:$0xff] }
   0x2   :  { %v10_v2 = vmul.f32 0.1, %v8_v0  ;;  %v11_v3 = vmul.f32 0.1, %v9_v1 }
   0x4   :  { %22 = vtanh.f32 %v10_v2 }
   0x5   :  { %24 = vtanh.f32 %v11_v3 }
   0xe   :  { %v23_v4 = vpop.eup %22 }
   0xf   :  { %v25_v5 = vpop.eup %24  ;;  %v14_v6 = vmul.f32 10.0, %v23_v4 }
  0x10   :  { %v15_v7 = vmul.f32 10.0, %v25_v5 }
  0x11   :  { %16 = vst [vmem:[%s49_s1] sm:$0xff] %v14_v6 }
  0x12   :  { %17 = vst [vmem:[%s49_s1 + $0x8] sm:$0xff] %v15_v7 }

</bundles_post_ra>
